<compile_context>
chip_gen: v7x
topology: tpu7x:2x2x1
jax: 0.10.0
libtpu: 0.0.40
codegen_flags: <defaults>
</compile_context>

<pallas_src>
import jax
import jax.numpy as jnp
from jax import lax
from jax.experimental import pallas as pl
from jax.experimental.pallas import tpu as pltpu

block_size = 36
n_embd = 64
head_size = 16


def head_kernel(x_ref, wqkv_ref, o_ref):
    # x_ref: (B, T, C); wqkv_ref: (C, 3H) packed [Wq | Wk | Wv]; o_ref: (B, T, H)
    B, T, C = x_ref.shape
    H = o_ref.shape[-1]

    # Flatten batch+time into one MXU M dimension (free: T is a multiple of 8).
    x2d = x_ref[...].reshape(B * T, C)                     # (B*T, C) f32
    w = wqkv_ref[...]                                      # (C, 3H)  f32

    # Single fused QKV projection: (B*T, C) x (C, 3H) -> (B*T, 3H)
    qkv = jnp.dot(x2d, w, preferred_element_type=jnp.float32)

    # Lane slices of the 48-lane projection result; reshape back to (B, T, H).
    # Scale goes on q (B*T x H elements) instead of wei (B*T*T); the reference
    # module multiplies by C**0.5.
    q = (qkv[:, 0:H] * (jnp.float32(C) ** 0.5)).reshape(B, T, H)
    k = qkv[:, H:2 * H].reshape(B, T, H)
    v = qkv[:, 2 * H:3 * H].reshape(B, T, H)

    # wei = q @ k^T, contraction over H, batched over B (no explicit transpose).
    wei = lax.dot_general(
        q, k,
        dimension_numbers=(((2,), (2,)), ((0,), (0,))),
        preferred_element_type=jnp.float32,
    )                                                      # (B, T, T)

    # Causal mask: col > row -> -inf. Diagonal is always unmasked, so padded
    # rows never produce an all -inf row (no NaN from softmax).
    row = lax.broadcasted_iota(jnp.int32, (T, T), 0)
    col = lax.broadcasted_iota(jnp.int32, (T, T), 1)
    wei = jnp.where((col <= row)[None, :, :], wei, -jnp.inf)

    # Numerically stable softmax along the last axis (exact divide).
    m = jnp.max(wei, axis=-1, keepdims=True)
    e = jnp.exp(wei - m)
    s = jnp.sum(e, axis=-1, keepdims=True)
    p = e / s

    # out = p @ v, contraction over key axis, batched over B.
    o_ref[...] = lax.dot_general(
        p, v,
        dimension_numbers=(((2,), (1,)), ((0,), (0,))),
        preferred_element_type=jnp.float32,
    )


def head_forward(x, wk, wq, wv):
    """x: (B, T, C) f32, wk/wq/wv: (C, H) f32 -> (B, T, H) f32 (eval-mode Head)."""
    B, T, C = x.shape
    H = wk.shape[1]

    # Fuse the three projection weights into one lane-packed (C, 3H) array
    # (order matches the kernel's q/k/v slicing).
    wqkv = jnp.concatenate([wq, wk, wv], axis=1)

    # Pad T to a sublane multiple of 8 so the in-kernel (B*T, C) flatten is a
    # free leading-dim merge. Padded rows are causal-diagonal-safe and sliced off.
    T_pad = ((T + 7) // 8) * 8
    xp = x if T_pad == T else jnp.pad(x, ((0, 0), (0, T_pad - T), (0, 0)))

    # Single-step kernel: the entire problem fits in one VMEM block on every
    # TPU generation, so no grid / pipelining is needed.
    out = pl.pallas_call(
        head_kernel,
        out_shape=jax.ShapeDtypeStruct((B, T_pad, H), jnp.float32),
        in_specs=[
            pl.BlockSpec((B, T_pad, C), lambda: (0, 0, 0)),
            pl.BlockSpec((C, 3 * H), lambda: (0, 0)),
        ],
        out_specs=pl.BlockSpec((B, T_pad, H), lambda: (0, 0, 0)),
    )(xp, wqkv)

    return out[:, :T, :]


def reference_head(x, wk, wq, wv):
    """Pure-JAX reference mirroring the PyTorch forward (eval mode)."""
    B, T, C = x.shape
    k = x @ wk
    q = x @ wq
    v = x @ wv
    wei = (q @ jnp.swapaxes(k, -2, -1)) * (C ** 0.5)
    tril = jnp.tril(jnp.ones((block_size, block_size)))
    wei = jnp.where(tril[:T, :T] == 0, -jnp.inf, wei)
    wei = jax.nn.softmax(wei, axis=-1)
    return wei @ v


if __name__ == "__main__":
    key = jax.random.PRNGKey(0)
    kx, kk, kq, kv = jax.random.split(key, 4)

    # Small shapes consistent with the module: B=4, T=block_size=36, C=64, H=16.
    B, T, C, H = 4, block_size, n_embd, head_size

    x = jax.random.normal(kx, (B, T, C), dtype=jnp.float32)
    # nn.Linear(n_embd, head_size, bias=False) weights, stored pre-transposed (C, H).
    bound = 1.0 / (C ** 0.5)
    wk = jax.random.uniform(kk, (C, H), jnp.float32, -bound, bound)
    wq = jax.random.uniform(kq, (C, H), jnp.float32, -bound, bound)
    wv = jax.random.uniform(kv, (C, H), jnp.float32, -bound, bound)

    out = head_forward(x, wk, wq, wv)
    out = jax.block_until_ready(out)

    ref = reference_head(x, wk, wq, wv)
    assert out.shape == (B, T, H)
    assert jnp.allclose(out, ref, atol=1e-4, rtol=1e-4), "mismatch vs reference"
    assert not jnp.any(jnp.isnan(out)), "NaN in kernel output"

    print("KERNEL_OK")
</pallas_src>

<mosaic_0001>
module attributes {stable_mosaic.version = 11 : i64} {
  func.func @head_kernel(%arg0: memref<4x40x64xf32, #tpu.memory_space<vmem>>, %arg1: memref<64x48xf32, #tpu.memory_space<vmem>>, %arg2: memref<4x40x16xf32, #tpu.memory_space<vmem>>) attributes {dimension_semantics = [], scalar_prefetch = 0 : i64, scratch_operands = 0 : i64, tpu.core_type = #tpu.core_type<tc>} {
    %c0 = arith.constant 0 : index
    %c0_0 = arith.constant 0 : index
    %c0_1 = arith.constant 0 : index
    %0 = vector.load %arg0[%c0, %c0_0, %c0_1] : memref<4x40x64xf32, #tpu.memory_space<vmem>>, vector<4x40x64xf32>
    %1 = vector.shape_cast %0 : vector<4x40x64xf32> to vector<160x64xf32>
    %c0_2 = arith.constant 0 : index
    %c0_3 = arith.constant 0 : index
    %2 = vector.load %arg1[%c0_2, %c0_3] : memref<64x48xf32, #tpu.memory_space<vmem>>, vector<64x48xf32>
    %cst = arith.constant dense<0.000000e+00> : vector<160x48xf32>
    %3 = tpu.matmul %1, %2, %cst {dimension_numbers = #tpu.dot_dimension_numbers<[1], [0], [0], [1], [0, 0, 1, 1], [], []>} : vector<160x64xf32>, vector<64x48xf32>, vector<160x48xf32> -> vector<160x48xf32>
    %4 = vector.extract_strided_slice %3 {offsets = [0, 0], sizes = [160, 16], strides = [1, 1]} : vector<160x48xf32> to vector<160x16xf32>
    %cst_4 = arith.constant 6.400000e+01 : f32
    %cst_5 = arith.constant 5.000000e-01 : f32
    %5 = math.powf %cst_4, %cst_5 : f32
    %6 = vector.broadcast %5 : f32 to vector<160x16xf32>
    %7 = arith.mulf %4, %6 : vector<160x16xf32>
    %8 = vector.shape_cast %7 : vector<160x16xf32> to vector<4x40x16xf32>
    %9 = vector.extract_strided_slice %3 {offsets = [0, 16], sizes = [160, 16], strides = [1, 1]} : vector<160x48xf32> to vector<160x16xf32>
    %10 = vector.shape_cast %9 : vector<160x16xf32> to vector<4x40x16xf32>
    %11 = vector.extract_strided_slice %3 {offsets = [0, 32], sizes = [160, 16], strides = [1, 1]} : vector<160x48xf32> to vector<160x16xf32>
    %12 = vector.shape_cast %11 : vector<160x16xf32> to vector<4x40x16xf32>
    %cst_6 = arith.constant dense<0.000000e+00> : vector<4x40x40xf32>
    %13 = tpu.matmul %8, %10, %cst_6 {dimension_numbers = #tpu.dot_dimension_numbers<[2], [2], [1], [1], [0, 0, 0, 1, 1, 1], [0], [0]>} : vector<4x40x16xf32>, vector<4x40x16xf32>, vector<4x40x40xf32> -> vector<4x40x40xf32>
    %14 = tpu.iota {dimensions = array<i32: 0>} : vector<40x40xi32>
    %15 = tpu.iota {dimensions = array<i32: 1>} : vector<40x40xi32>
    %16 = arith.cmpi sle, %15, %14 : vector<40x40xi32>
    %17 = vector.shape_cast %16 : vector<40x40xi1> to vector<1x40x40xi1>
    %cst_7 = arith.constant 0xFF800000 : f32
    %18 = vector.shape_cast %17 : vector<1x40x40xi1> to vector<1x40x40xi1>
    %19 = vector.broadcast %18 : vector<1x40x40xi1> to vector<4x40x40xi1>
    %20 = vector.broadcast %cst_7 : f32 to vector<4x40x40xf32>
    %21 = arith.select %19, %13, %20 : vector<4x40x40xi1>, vector<4x40x40xf32>
    %cst_8 = arith.constant dense<0xFF800000> : vector<4x40xf32>
    %22 = vector.multi_reduction <maximumf>, %21, %cst_8 [2] : vector<4x40x40xf32> to vector<4x40xf32>
    %23 = vector.shape_cast %22 : vector<4x40xf32> to vector<4x40x1xf32>
    %24 = vector.broadcast %23 : vector<4x40x1xf32> to vector<4x40x40xf32>
    %25 = arith.subf %21, %24 : vector<4x40x40xf32>
    %26 = math.exp %25 : vector<4x40x40xf32>
    %cst_9 = arith.constant dense<0.000000e+00> : vector<4x40xf32>
    %27 = vector.multi_reduction <add>, %26, %cst_9 [2] : vector<4x40x40xf32> to vector<4x40xf32>
    %28 = vector.shape_cast %27 : vector<4x40xf32> to vector<4x40x1xf32>
    %29 = vector.broadcast %28 : vector<4x40x1xf32> to vector<4x40x40xf32>
    %30 = arith.divf %26, %29 : vector<4x40x40xf32>
    %cst_10 = arith.constant dense<0.000000e+00> : vector<4x40x16xf32>
    %31 = tpu.matmul %30, %12, %cst_10 {dimension_numbers = #tpu.dot_dimension_numbers<[2], [1], [1], [2], [0, 0, 0, 1, 1, 2], [0], [0]>} : vector<4x40x40xf32>, vector<4x40x16xf32>, vector<4x40x16xf32> -> vector<4x40x16xf32>
    %c0_11 = arith.constant 0 : index
    %c0_12 = arith.constant 0 : index
    %c0_13 = arith.constant 0 : index
    %32 = vector.load %arg2[%c0_11, %c0_12, %c0_13] : memref<4x40x16xf32, #tpu.memory_space<vmem>>, vector<4x40x16xf32>
    tpu.vector_store %arg2[%c0_11, %c0_12, %c0_13], %31 {strides = array<i32>} : memref<4x40x16xf32, #tpu.memory_space<vmem>>, vector<4x40x16xf32>,
    return
  }
}

</mosaic_0001>

<bundles_post_ra>
// kernel: tpu_custom_call.1
= control target key start
LH: loop header
LB: loop body
LE: loop exit
PB: predicated region body
PF: predicated region fallthrough
CT: control target
= control target key end

     0   :  { %7 = vsyncpa [#allocation3], 0  ;;  %s2287_s9 = smov [#allocation2]   ;;  %s3030_s0 = inlined_call_operand.hbm [shape: f32[4,40,64], index: 0, kind: input, shape index: {}]   ;;  %s3031_s1 = inlined_call_operand.vmem [shape: f32[64,48], index: 1, kind: input, shape index: {}]   ;;  %s3032_s2 = inlined_call_operand.vmem [shape: f32[4,40,16], index: 2, kind: output, shape index: {}]  }
   0x1   :  { %s13_s10 = sshll.u32 %s2287_s9, 4  ;;  %s2263_s13 = scalar_lea.hbm %s3030_s0, 2560  ;;  %s14_s10 = int_to_ptr.vmem [resolvable:$true] %s13_s10 }
   0x2   :  { %p2264_p0 = scmp.ne.s32.totalorder %s3030_s0, %s2263_s13  ;;  %p2267_p1 = scmp.lt.u32.totalorder %s2263_s13, %s3030_s0 }
   0x4   :  { %p2269_p2 = pnand %p2267_p1, %p2264_p0 }
   0x6   :  { %2272 = shalt.err (!%p2269_p2)
}
   0x7   :  { %s2273_s18 = scalar_lea.vmem %s14_s10, 2560  ;;  %p2278_p4 = scmp.lt.s32.totalorder %s14_s10, %s14_s10 }
   0x8   :  { %p2274_p3 = scmp.ne.s32.totalorder %s14_s10, %s2273_s18  ;;  %p2279_p5 = scmp.lt.s32.totalorder %s2273_s18, %s2273_s18 }
   0xa   :  { %p2280_p6 = por %p2279_p5, %p2278_p4 }
   0xc   :  { %p2281_p7 = pnand %p2280_p6, %p2274_p3 }
   0xe   :  { %2284 = shalt.err (!%p2281_p7)
}
   0xf   :  { %s2288_s19 = smov 128   ;;  %s2289_s20 = smov 8  }
  0x10   :  { %19 = dma.hbm_to_vmem [thread:$0]  %s3030_s0, 2560, %s14_s10, [#allocation3], %s2288_s19, %s2288_s19, %s2289_s20  }
  0x11   :  { %2285 = dma.done.wait [#allocation3], 2560  }
  0x12   :  { %2286 = vsyncadd [#allocation3], 4294964736  ;;  %v45_v0 = vld [vmem:[%s3031_s1] sm:$0xff]  ;;  %v46_v1 = vld [vmem:[%s3031_s1 + $0x8] sm:$0xff]  ;;  %vm53_vm0 = vcmask 523264   ;;  %v2290_v32 = vmov 0.0|0.0  }
  0x13   :  { %v47_v2 = vld [vmem:[%s3031_s1 + $0x10] sm:$0xff]  ;;  %v2023_v3 = vpack.c.bf16 %v46_v1, %v45_v0  ;;  %v48_v4 = vld [vmem:[%s3031_s1 + $0x18] sm:$0xff]  ;;  %v49_v6 = vld [vmem:[%s3031_s1 + $0x20] sm:$0xff]  ;;  %2039 = vmatprep.subr.bf16.mxu1 %v2290_v32  ;;  %vm2292_vm1 = vmmov 0   ;;  %v2293_v43 = vmov 0.0   ;;  %s2294_s10 = smov 96  }
  0x14   :  { %v2027_v5 = vpack.c.bf16 %v48_v4, %v47_v2  ;;  %v50_v7 = vld [vmem:[%s3031_s1 + $0x28] sm:$0xff]  ;;  %v25_v8 = vld [vmem:[#allocation2] sm:$0xff]  ;;  %v51_v10 = vld [vmem:[%s3031_s1 + $0x30] sm:$0xff]  ;;  %1833 = vmatprep.mubr.msk.f32.mxu1 %vm2292_vm1, %v2293_v43  ;;  %vm314_vm2 = vcmask 130048   ;;  %vm863_vm5 = vcmask 326656  }
  0x15   :  { %2024 = vmatprep.subr.bf16.mxu0 %v2023_v3  ;;  %1793 = vmatprep.mubr.msk.f32.mxu0 %vm53_vm0, %v25_v8  ;;  %v2031_v9 = vpack.c.bf16 %v50_v7, %v49_v6  ;;  %v52_v11 = vld [vmem:[%s3031_s1 + $0x38] sm:$0xff]  ;;  %v26_v13 = vld [vmem:[#allocation2 + $0x8] sm:$0xff]  ;;  %v27_v14 = vld [vmem:[#allocation2 + $0x10] sm:$0xff]  ;;  %s2291_s1 = smov 112  }
  0x16   :  { %2026 = vmatpush3.bf16.msra.mxu0 %v2023_v3  ;;  %v2035_v12 = vpack.c.bf16 %v52_v11, %v51_v10  ;;  %v28_v15 = vld [vmem:[#allocation2 + $0x18] sm:$0xff]  ;;  %v29_v16 = vld [vmem:[#allocation2 + $0x20] sm:$0xff]  ;;  %v30_v17 = vld [vmem:[#allocation2 + $0x28] sm:$0xff] }
  0x17   :  { %2028 = vmatprep.subr.bf16.mxu0 %v2027_v5  ;;  %v31_v18 = vld [vmem:[#allocation2 + $0x30] sm:$0xff]  ;;  %v32_v19 = vld [vmem:[#allocation2 + $0x38] sm:$0xff]  ;;  %v33_v20 = vld [vmem:[#allocation2 + $0x40] sm:$0xff] }
  0x18   :  { %v34_v21 = vld [vmem:[#allocation2 + $0x48] sm:$0xff]  ;;  %v35_v22 = vld [vmem:[#allocation2 + $0x50] sm:$0xff]  ;;  %v36_v23 = vld [vmem:[#allocation2 + $0x58] sm:$0xff] }
  0x19   :  { %v37_v24 = vld [vmem:[#allocation2 + $0x60] sm:$0xff]  ;;  %v38_v25 = vld [vmem:[#allocation2 + $0x68] sm:$0xff]  ;;  %v39_v26 = vld [vmem:[#allocation2 + $0x70] sm:$0xff] }
  0x1a   :  { %2030 = vmatpush3.bf16.msra.mxu0 %v2027_v5  ;;  %v40_v27 = vld [vmem:[#allocation2 + $0x78] sm:$0xff]  ;;  %v41_v28 = vld [vmem:[#allocation2 + $0x80] sm:$0xff]  ;;  %v42_v29 = vld [vmem:[#allocation2 + $0x88] sm:$0xff] }
  0x1b   :  { %2032 = vmatprep.subr.bf16.mxu0 %v2031_v9  ;;  %v43_v30 = vld [vmem:[#allocation2 + $0x90] sm:$0xff]  ;;  %v44_v31 = vld [vmem:[#allocation2 + $0x98] sm:$0xff]  ;;  %vm2464_vm3 = vmpackc.low %vm314_vm2, %vm314_vm2 }
  0x1e   :  { %2034 = vmatpush3.bf16.msra.mxu0 %v2031_v9 }
  0x1f   :  { %2036 = vmatprep.subr.bf16.mxu0 %v2035_v12 }
  0x22   :  { %2038 = vmatpush3.bf16.msra.mxu0 %v2035_v12 }
  0x23   :  { %2055 = vmatprep.subr.bf16.mxu0 %v2290_v32 }
  0x25   :  { %1794 = vmatmul.mubr.msk.f32.vlgmr.msra.gmra.mrb[0].mxu0 %vm53_vm0, %v26_v13 }
  0x26   :  { %1796 = vmatprep.mubr.msk.f32.mxu0 %vm53_vm0, %v27_v14 }
  0x29   :  { %1797 = vmatmul.mubr.msk.f32.gmra.mrb[2].mxu0 %vm53_vm0, %v28_v15 }
  0x2a   :  { %1799 = vmatprep.mubr.msk.f32.mxu0 %vm53_vm0, %v29_v16 }
  0x2d   :  { %1800 = vmatmul.mubr.msk.f32.gmra.mrb[4].mxu0 %vm53_vm0, %v30_v17 }
  0x2e   :  { %1802 = vmatprep.mubr.msk.f32.mxu0 %vm53_vm0, %v31_v18 }
  0x31   :  { %1803 = vmatmul.mubr.msk.f32.gmra.mrb[6].mxu0 %vm53_vm0, %v32_v19 }
  0x32   :  { %1805 = vmatprep.mubr.msk.f32.mxu0 %vm53_vm0, %v33_v20 }
  0x35   :  { %1806 = vmatmul.mubr.msk.f32.gmra.mrb[8].mxu0 %vm53_vm0, %v34_v21 }
  0x36   :  { %1808 = vmatprep.mubr.msk.f32.mxu0 %vm53_vm0, %v35_v22 }
  0x39   :  { %1809 = vmatmul.mubr.msk.f32.gmra.mrb[10].mxu0 %vm53_vm0, %v36_v23 }
  0x3a   :  { %1811 = vmatprep.mubr.msk.f32.mxu0 %vm53_vm0, %v37_v24 }
  0x3d   :  { %1812 = vmatmul.mubr.msk.f32.gmra.mrb[12].mxu0 %vm53_vm0, %v38_v25 }
  0x3e   :  { %1814 = vmatprep.mubr.msk.f32.mxu0 %vm53_vm0, %v39_v26 }
  0x41   :  { %1815 = vmatmul.mubr.msk.f32.gmra.mrb[14].mxu0 %vm53_vm0, %v40_v27 }
  0x42   :  { %1817 = vmatprep.mubr.msk.f32.mxu0 %vm53_vm0, %v41_v28 }
  0x45   :  { %1818 = vmatmul.mubr.msk.f32.gmra.mrb[16].mxu0 %vm53_vm0, %v42_v29 }
  0x46   :  { %1820 = vmatprep.mubr.msk.f32.mxu0 %vm53_vm0, %v43_v30 }
  0x49   :  { %1821 = vmatmul.mubr.msk.f32.gmra.mrb[18].mxu0 %vm53_vm0, %v44_v31 }
  0x4a   :  { %1883 = vmatprep.mubr.msk.f32.mxu0 %vm2292_vm1, %v2293_v43 }
  0xf8   :  { %v2368_v33 = vpop.f32.mrb[0].mxu0 }
  0xf9   :  { %v2370_v34 = vpop.f32.mrb[1].mxu0  ;;  %v280_v21 = vmul.f32 8.0, %v2368_v33 }
  0xfa   :  { %v2143_v35 = vpack.i.bf16 %v2368_v33, %v2370_v34  ;;  %v279_v15 = vmul.f32 8.0, %v2370_v34 }
  0xfc   :  { %2104 = vrot.lane.b32.xlu0 %v2143_v35, %s2291_s1  ;;  %v2375_v36 = vpop.f32.mrb[2].mxu0 }
  0xfd   :  { %v2377_v37 = vpop.f32.mrb[3].mxu0  ;;  %v282_v29 = vmul.f32 8.0, %v2375_v36 }
  0xfe   :  { %v2153_v38 = vpack.i.bf16 %v2375_v36, %v2377_v37  ;;  %v281_v26 = vmul.f32 8.0, %v2377_v37 }
 0x100   :  { %v2381_v39 = vpop.f32.mrb[4].mxu0  ;;  %2109 = vrot.lane.b32.xlu0 %v2153_v38, %s2291_s1 }
 0x101   :  { %v2384_v40 = vpop.f32.mrb[5].mxu0  ;;  %v284_v37 = vmul.f32 8.0, %v2381_v39 }
 0x102   :  { %312 = vrot.lane.b32.xlu1 %v2384_v40, %s2291_s1  ;;  %v283_v31 = vmul.f32 8.0, %v2384_v40 }
 0x104   :  { %v2388_v41 = vpop.f32.mrb[6].mxu0 }
 0x105   :  { %v2390_v42 = vpop.f32.mrb[7].mxu0 }
 0x106   :  { %v2148_v44 = vpack.i.bf16 %v2390_v42, %v2381_v39  ;;  %v285_v39 = vmul.f32 8.0, %v2390_v42  ;;  %v286_v42 = vmul.f32 8.0, %v2388_v41 }
 0x108   :  { %2114 = vrot.lane.b32.xlu1 %v2148_v44, %s2291_s1  ;;  %v2399_v45 = vpop.f32.mrb[8].mxu0 }
 0x109   :  { %v2401_v46 = vpop.f32.mrb[9].mxu0 }
 0x10a   :  { %v2158_v47 = vpack.i.bf16 %v2401_v46, %v2388_v41 }
 0x10c   :  { %2119 = vrot.lane.b32.xlu0 %v2158_v47, %s2291_s1  ;;  %v2406_v48 = vpop.f32.mrb[10].mxu0  ;;  %443 = vrot.lane.b32.xlu1 %v2399_v45, %s2291_s1 }
 0x10d   :  { %v2410_v49 = vpop.f32.mrb[11].mxu0 }
 0x10e   :  { %v2163_v50 = vpack.i.bf16 %v2406_v48, %v2410_v49 }
 0x110   :  { %2124 = vrot.lane.b32.xlu0 %v2163_v50, %s2291_s1  ;;  %v2415_v51 = vpop.f32.mrb[12].mxu0 }
 0x111   :  { %v2417_v52 = vpop.f32.mrb[13].mxu0  ;;  %v292_v41 = vmul.f32 8.0, %v2415_v51 }
 0x112   :  { %v2421_v53 = vpack.i.bf16 %v2415_v51, %v2417_v52 }
 0x114   :  { %2134 = vrot.lane.b32.xlu0 %v2421_v53, %s2291_s1  ;;  %v2425_v54 = vpop.f32.mrb[14].mxu0 }
 0x115   :  { %v2427_v55 = vpop.f32.mrb[15].mxu0 }
 0x116   :  { %v293_v51 = vmul.f32 8.0, %v2427_v55 }
 0x118   :  { %573 = vrot.lane.b32.xlu0 %v2427_v55, %s2291_s1  ;;  %v2431_v56 = vpop.f32.mrb[16].mxu0 }
 0x119   :  { %v2433_v57 = vpop.f32.mrb[17].mxu0 }
 0x11a   :  { %v2437_v58 = vpack.i.bf16 %v2433_v57, %v2425_v54 }
 0x11c   :  { %2149 = vrot.lane.b32.xlu0 %v2148_v44, %s2294_s10  ;;  %2129 = vrot.lane.b32.xlu1 %v2437_v58, %s2291_s1  ;;  %v2442_v59 = vpop.f32.mrb[18].mxu0 }
 0x11d   :  { %v2444_v60 = vpop.f32.mrb[19].mxu0 }
 0x11e   :  { %v2448_v61 = vpack.i.bf16 %v2444_v60, %v2431_v56 }
 0x120   :  { %2159 = vrot.lane.b32.xlu0 %v2158_v47, %s2294_s10  ;;  %2139 = vrot.lane.b32.xlu1 %v2448_v61, %s2291_s1 }
 0x124   :  { %1212 = vrot.lane.b32.xlu0 %v2399_v45, %s2294_s10  ;;  %703 = vrot.lane.b32.xlu1 %v2442_v59, %s2291_s1 }
 0x128   :  { %2144 = vrot.lane.b32.xlu1 %v2143_v35, %s2294_s10 }
 0x12c   :  { %2154 = vrot.lane.b32.xlu1 %v2153_v38, %s2294_s10  ;;  %v289_v38 = vmul.f32 8.0, %v2410_v49  ;;  %v290_v49 = vmul.f32 8.0, %v2406_v48  ;;  %v291_v48 = vmul.f32 8.0, %v2417_v52 }
 0x130   :  { %1092 = vrot.lane.b32.xlu1 %v2384_v40, %s2294_s10 }
 0x134   :  { %2164 = vrot.lane.b32.xlu1 %v2163_v50, %s2294_s10 }
 0x16e   :  { %v2105_v62 = vpop.permute.xlu0 %2104 }
 0x16f   :  { %v2107_v63 = vunpack.i.h.bf16 %v2105_v62  ;;  %v2106_v0 = vunpack.i.l.bf16 %v2105_v62 }
 0x171   :  { %v2040_v2 = vpack.c.bf16 %v2107_v63, %v2106_v0 }
 0x172   :  { %v2110_v3 = vpop.permute.xlu0 %2109 }
 0x173   :  { %2042 = vmatpush3.bf16.xpose.msk.msra.mxu1 %vm2464_vm3, %v2040_v2  ;;  %v2112_v4 = vunpack.i.h.bf16 %v2110_v3  ;;  %v2111_v5 = vunpack.i.l.bf16 %v2110_v3 }
 0x174   :  { %2043 = vmatprep.subr.bf16.mxu1 %v2290_v32  ;;  %v313_v7 = vpop.permute.xlu1 %312 }
 0x175   :  { %v2044_v6 = vpack.c.bf16 %v2112_v4, %v2111_v5 }
 0x17a   :  { %v2115_v8 = vpop.permute.xlu1 %2114 }
 0x17b   :  { %2046 = vmatpush3.bf16.xpose.msk.msra.mxu1 %vm2464_vm3, %v2044_v6  ;;  %v2117_v10 = vunpack.i.h.bf16 %v2115_v8  ;;  %v2116_v11 = vunpack.i.l.bf16 %v2115_v8 }
 0x17c   :  { %1831 = vmatprep.subr.mxu1 %v2293_v43 }
 0x17d   :  { %v2048_v16 = vpack.c.bf16 %v2117_v10, %v2116_v11 }
 0x17e   :  { %v2120_v9 = vpop.permute.xlu0 %2119  ;;  %v444_v24 = vpop.permute.xlu1 %443 }
 0x17f   :  { %v2122_v22 = vunpack.i.h.bf16 %v2120_v9  ;;  %v2121_v23 = vunpack.i.l.bf16 %v2120_v9 }
 0x181   :  { %v2052_v27 = vpack.c.bf16 %v2122_v22, %v2121_v23 }
 0x182   :  { %v2125_v12 = vpop.permute.xlu0 %2124 }
 0x183   :  { %v2127_v13 = vunpack.i.h.bf16 %v2125_v12  ;;  %v2126_v14 = vunpack.i.l.bf16 %v2125_v12  ;;  %1832 = vmatpush3.xpose.msk.msra.mxu1 %vm314_vm2, %v313_v7  ;;  %v287_v7 = vmul.f32 8.0, %v2401_v46  ;;  %v288_v46 = vmul.f32 8.0, %v2399_v45 }
 0x184   :  { %2047 = vmatprep.subr.bf16.mxu1 %v2290_v32  ;;  %v294_v45 = vmul.f32 8.0, %v2425_v54  ;;  %v296_v54 = vmul.f32 8.0, %v2431_v56  ;;  %v298_v56 = vmul.f32 8.0, %v2442_v59 }
 0x185   :  { %v2056_v17 = vpack.c.bf16 %v2127_v13, %v2126_v14  ;;  %v295_v14 = vmul.f32 8.0, %v2433_v57  ;;  %v297_v57 = vmul.f32 8.0, %v2444_v60 }
 0x186   :  { %1834 = vmatmul.mubr.msk.f32.vlgmr.msra.gmra.mrb[0].mxu1 %vm314_vm2, %v279_v15  ;;  %v2135_v18 = vpop.permute.xlu0 %2134 }
 0x187   :  { %v2137_v19 = vunpack.i.h.bf16 %v2135_v18  ;;  %v2136_v20 = vunpack.i.l.bf16 %v2135_v18  ;;  %2050 = vmatpush3.bf16.xpose.msk.msra.mxu1 %vm2464_vm3, %v2048_v16  ;;  %2058 = vmatpush3.bf16.xpose.msk.msra.mxu0 %vm2464_vm3, %v2056_v17  ;;  %v820_v17 = vlaneseq }
 0x188   :  { %1836 = vmatprep.mubr.msk.f32.mxu1 %vm2292_vm1, %v2293_v43  ;;  %2051 = vmatprep.subr.bf16.mxu1 %v2290_v32 }
 0x189   :  { %2059 = vmatprep.subr.bf16.mxu0 %v2290_v32  ;;  %v2060_v25 = vpack.c.bf16 %v2137_v19, %v2136_v20  ;;  %v2586_v18 = vshrl.u32 %v820_v17, 7  ;;  %v2588_v19 = vand.u32 127, %v820_v17 }
 0x18a   :  { %1837 = vmatmul.mubr.msk.f32.gmra.mrb[2].mxu1 %vm314_vm2, %v280_v21  ;;  %v574_v35 = vpop.permute.xlu0 %573 }
 0x18b   :  { %1839 = vmatprep.mubr.msk.f32.mxu1 %vm2292_vm1, %v2293_v43  ;;  %vm828_vm4 = vcmp.le.s32.totalorder %v2588_v19, %v2586_v18  ;;  %v2593_v60 = vadd.s32 8, %v2586_v18 }
 0x18d   :  { %vm829_vm6 = vcmp.le.s32.totalorder %v2588_v19, %v2593_v60 }
 0x18e   :  { %1840 = vmatmul.mubr.msk.f32.gmra.mrb[4].mxu1 %vm314_vm2, %v281_v26  ;;  %v2130_v28 = vpop.permute.xlu1 %2129  ;;  %v2150_v52 = vpop.permute.xlu0 %2149 }
 0x18f   :  { %2054 = vmatpush3.bf16.xpose.msk.msra.mxu1 %vm2464_vm3, %v2052_v27  ;;  %2062 = vmatpush3.bf16.xpose.msk.msra.mxu0 %vm2464_vm3, %v2060_v25  ;;  %v2132_v33 = vunpack.i.h.bf16 %v2130_v28  ;;  %v2131_v34 = vunpack.i.l.bf16 %v2130_v28  ;;  %v2152_v1 = vunpack.i.h.bf16 %v2150_v52  ;;  %v2151_v9 = vunpack.i.l.bf16 %v2150_v52 }
 0x190   :  { %1842 = vmatprep.mubr.msk.f32.mxu1 %vm2292_vm1, %v2293_v43  ;;  %1856 = vmatprep.subr.mxu1 %v2293_v43 }
 0x191   :  { %1881 = vmatprep.subr.mxu0 %v2293_v43  ;;  %v2064_v40 = vpack.c.bf16 %v2132_v33, %v2131_v34  ;;  %v2078_v11 = vpack.c.bf16 %v2152_v1, %v2151_v9 }
 0x192   :  { %1843 = vmatmul.mubr.msk.f32.gmra.mrb[6].mxu1 %vm314_vm2, %v282_v29  ;;  %v2140_v30 = vpop.permute.xlu1 %2139  ;;  %v2160_v10 = vpop.permute.xlu0 %2159  ;;  %v2617_v29 = vadd.s32 24, %v2586_v18 }
 0x193   :  { %1845 = vmatprep.mubr.msk.f32.mxu1 %vm2292_vm1, %v2293_v43  ;;  %v2142_v62 = vunpack.i.h.bf16 %v2140_v30  ;;  %v2141_v63 = vunpack.i.l.bf16 %v2140_v30  ;;  %v2162_v12 = vunpack.i.h.bf16 %v2160_v10  ;;  %v2161_v13 = vunpack.i.l.bf16 %v2160_v10 }
 0x194   :  { %vm831_vm8 = vcmp.le.s32.totalorder %v2588_v19, %v2617_v29 }
 0x195   :  { %v2068_v5 = vpack.c.bf16 %v2142_v62, %v2141_v63  ;;  %v2081_v15 = vpack.c.bf16 %v2162_v12, %v2161_v13 }
 0x196   :  { %1846 = vmatmul.mubr.msk.f32.gmra.mrb[8].mxu1 %vm314_vm2, %v283_v31  ;;  %v704_v36 = vpop.permute.xlu1 %703  ;;  %v1213_v16 = vpop.permute.xlu0 %1212 }
 0x197   :  { %1857 = vmatpush3.xpose.msk.msra.mxu1 %vm314_vm2, %v444_v24  ;;  %1882 = vmatpush3.xpose.msk.msra.mxu0 %vm314_vm2, %v574_v35  ;;  %v2605_v24 = vadd.s32 16, %v2586_v18  ;;  %v2629_v35 = vadd.s32 32, %v2586_v18 }
 0x198   :  { %1858 = vmatprep.mubr.msk.f32.mxu1 %vm2292_vm1, %v2293_v43  ;;  %2063 = vmatprep.subr.bf16.mxu1 %v2290_v32 }
 0x199   :  { %2071 = vmatprep.subr.bf16.mxu0 %v2290_v32  ;;  %vm830_vm7 = vcmp.le.s32.totalorder %v2588_v19, %v2605_v24  ;;  %vm832_vm9 = vcmp.le.s32.totalorder %v2588_v19, %v2629_v35 }
 0x19a   :  { %1859 = vmatmul.mubr.msk.f32.vlgmr.msra.gmra.mrb[10].mxu1 %vm314_vm2, %v284_v37  ;;  %1884 = vmatmul.mubr.msk.f32.vlgmr.msra.gmra.mrb[20].mxu0 %vm314_vm2, %v289_v38  ;;  %v2145_v44 = vpop.permute.xlu1 %2144 }
 0x19b   :  { %v2147_v47 = vunpack.i.h.bf16 %v2145_v44  ;;  %v2146_v50 = vunpack.i.l.bf16 %v2145_v44  ;;  %2066 = vmatpush3.bf16.xpose.msk.msra.mxu1 %vm2464_vm3, %v2064_v40  ;;  %1861 = vmatprep.mubr.msk.f32.mxu1 %vm2292_vm1, %v2293_v43 }
 0x19c   :  { %1886 = vmatprep.mubr.msk.f32.mxu0 %vm2292_vm1, %v2293_v43  ;;  %2067 = vmatprep.subr.bf16.mxu1 %v2290_v32 }
 0x19d   :  { %v2072_v0 = vpack.c.bf16 %v2147_v47, %v2146_v50 }
 0x19e   :  { %1862 = vmatmul.mubr.msk.f32.gmra.mrb[12].mxu1 %vm314_vm2, %v285_v39  ;;  %1887 = vmatmul.mubr.msk.f32.gmra.mrb[22].mxu0 %vm314_vm2, %v290_v49  ;;  %v2155_v2 = vpop.permute.xlu1 %2154 }
 0x19f   :  { %v2157_v3 = vunpack.i.h.bf16 %v2155_v2  ;;  %v2156_v4 = vunpack.i.l.bf16 %v2155_v2  ;;  %2073 = vmatpush3.bf16.msra.mxu0 %v2072_v0  ;;  %1864 = vmatprep.mubr.msk.f32.mxu1 %vm2292_vm1, %v2293_v43 }
 0x1a0   :  { %1889 = vmatprep.mubr.msk.f32.mxu0 %vm2292_vm1, %v2293_v43  ;;  %2074 = vmatprep.subr.bf16.mxu0 %v2290_v32 }
 0x1a1   :  { %v2075_v6 = vpack.c.bf16 %v2157_v3, %v2156_v4 }
 0x1a2   :  { %1865 = vmatmul.mubr.msk.f32.gmra.mrb[14].mxu1 %vm314_vm2, %v286_v42  ;;  %1890 = vmatmul.mubr.msk.f32.gmra.mrb[24].mxu0 %vm314_vm2, %v291_v48  ;;  %v1093_v8 = vpop.permute.xlu1 %1092 }
 0x1a3   :  { %2070 = vmatpush3.bf16.xpose.msk.msra.mxu1 %vm2464_vm3, %v2068_v5  ;;  %2076 = vmatpush3.bf16.msra.mxu0 %v2075_v6 }
 0x1a4   :  { %1867 = vmatprep.mubr.msk.f32.mxu1 %vm2292_vm1, %v2293_v43  ;;  %1892 = vmatprep.mubr.msk.f32.mxu0 %vm2292_vm1, %v2293_v43 }
 0x1a5   :  { %1931 = vmatprep.subr.mxu0 %v2293_v43  ;;  %1906 = vmatprep.subr.mxu1 %v2293_v43 }
 0x1a6   :  { %1868 = vmatmul.mubr.msk.f32.gmra.mrb[16].mxu1 %vm314_vm2, %v287_v7  ;;  %1893 = vmatmul.mubr.msk.f32.gmra.mrb[26].mxu0 %vm314_vm2, %v292_v41  ;;  %v2759_v35 = vpop.permute.xlu1 %2164 }
 0x1a7   :  { %1932 = vmatpush3.msra.mxu0 %v1093_v8  ;;  %1870 = vmatprep.mubr.msk.f32.mxu1 %vm2292_vm1, %v2293_v43 }
 0x1a8   :  { %1895 = vmatprep.mubr.msk.f32.mxu0 %vm2292_vm1, %v2293_v43  ;;  %2083 = vmatprep.subr.bf16.mxu0 %v2290_v32 }
 0x1aa   :  { %1871 = vmatmul.mubr.msk.f32.gmra.mrb[18].mxu1 %vm314_vm2, %v288_v46  ;;  %1896 = vmatmul.mubr.msk.f32.gmra.mrb[28].mxu0 %vm314_vm2, %v293_v51 }
 0x1ab   :  { %1907 = vmatpush3.xpose.msk.msra.mxu1 %vm314_vm2, %v704_v36  ;;  %1908 = vmatprep.mubr.msk.f32.mxu1 %vm2292_vm1, %v2293_v43 }
 0x1ac   :  { %2077 = vmatprep.subr.bf16.mxu1 %v2290_v32  ;;  %1933 = vmatprep.mubr.msk.f32.mxu0 %vm2292_vm1, %v2293_v43 }
 0x1ae   :  { %1909 = vmatmul.mubr.msk.f32.vlgmr.msra.gmra.mrb[20].mxu1 %vm314_vm2, %v294_v45 }
 0x1af   :  { %2079 = vmatpush3.bf16.msra.mxu1 %v2078_v11  ;;  %1911 = vmatprep.mubr.msk.f32.mxu1 %vm2292_vm1, %v2293_v43 }
 0x1b0   :  { %2080 = vmatprep.subr.bf16.mxu1 %v2290_v32 }
 0x1b2   :  { %1912 = vmatmul.mubr.msk.f32.gmra.mrb[22].mxu1 %vm314_vm2, %v295_v14 }
 0x1b3   :  { %2082 = vmatpush3.bf16.msra.mxu1 %v2081_v15  ;;  %1914 = vmatprep.mubr.msk.f32.mxu1 %vm2292_vm1, %v2293_v43 }
 0x1b4   :  { %1956 = vmatprep.subr.mxu1 %v2293_v43 }
 0x1b6   :  { %1915 = vmatmul.mubr.msk.f32.gmra.mrb[24].mxu1 %vm314_vm2, %v296_v54 }
 0x1b7   :  { %1957 = vmatpush3.msra.mxu1 %v1213_v16  ;;  %1917 = vmatprep.mubr.msk.f32.mxu1 %vm2292_vm1, %v2293_v43 }
 0x1b8   :  { %2089 = vmatprep.subr.bf16.mxu1 %v2290_v32 }
 0x1ba   :  { %1918 = vmatmul.mubr.msk.f32.gmra.mrb[26].mxu1 %vm314_vm2, %v297_v57 }
 0x1bb   :  { %1920 = vmatprep.mubr.msk.f32.mxu1 %vm2292_vm1, %v2293_v43 }
 0x1be   :  { %1921 = vmatmul.mubr.msk.f32.gmra.mrb[28].mxu1 %vm314_vm2, %v298_v56 }
 0x1bf   :  { %1958 = vmatprep.mubr.msk.f32.mxu1 %vm2292_vm1, %v2293_v43 }
 0x259   :  { %v406_v20 = vpop.f32.mrb[0].mxu1 }
 0x25a   :  { %v2598_v21 = vsel %vm828_vm4, %v406_v20, -inf  ;;  %v1835_v22 = vpop.f32.mrb[1].mxu1 }
 0x25b   :  { %v864_v23 = vsel %vm863_vm5, %v2598_v21, -inf }
 0x25c   :  { %865 = vmax.xlane.f32.xlu0 %v864_v23 }
 0x25d   :  { %v411_v25 = vpop.f32.mrb[2].mxu1 }
 0x25e   :  { %v2610_v26 = vsel %vm829_vm6, %v411_v25, -inf  ;;  %v1838_v27 = vpop.f32.mrb[3].mxu1 }
 0x25f   :  { %v867_v28 = vsel %vm863_vm5, %v2610_v26, -inf }
 0x260   :  { %868 = vmax.xlane.f32.xlu0 %v867_v28 }
 0x261   :  { %v416_v30 = vpop.f32.mrb[4].mxu1 }
 0x262   :  { %v2622_v31 = vsel %vm830_vm7, %v416_v30, -inf  ;;  %v1841_v33 = vpop.f32.mrb[5].mxu1 }
 0x263   :  { %v870_v34 = vsel %vm863_vm5, %v2622_v31, -inf }
 0x264   :  { %871 = vmax.xlane.f32.xlu1 %v870_v34 }
 0x265   :  { %v421_v36 = vpop.f32.mrb[6].mxu1 }
 0x266   :  { %v2634_v37 = vsel %vm831_vm8, %v421_v36, -inf  ;;  %v1844_v38 = vpop.f32.mrb[7].mxu1 }
 0x267   :  { %v873_v40 = vsel %vm863_vm5, %v2634_v37, -inf }
 0x268   :  { %874 = vmax.xlane.f32.xlu1 %v873_v40 }
 0x269   :  { %v426_v44 = vpop.f32.mrb[8].mxu1 }
 0x26a   :  { %v2643_v47 = vsel %vm832_vm9, %v426_v44, -inf  ;;  %v1847_v50 = vpop.f32.mrb[9].mxu1 }
 0x26b   :  { %v876_v39 = vsel %vm863_vm5, %v2643_v47, -inf }
 0x26c   :  { %877 = vmax.xlane.f32.xlu1 %v876_v39 }
 0x26d   :  { %v536_v49 = vpop.f32.mrb[10].mxu1  ;;  %v666_v62 = vpop.f32.mrb[20].mxu0 }
 0x26e   :  { %v2650_v63 = vsel %vm828_vm4, %v536_v49, -inf  ;;  %v1860_v0 = vpop.f32.mrb[11].mxu1  ;;  %v1885_v2 = vpop.f32.mrb[21].mxu0  ;;  %v2657_v4 = vsel %vm828_vm4, %v666_v62, -inf }
 0x26f   :  { %v879_v3 = vsel %vm863_vm5, %v2650_v63, -inf  ;;  %v894_v52 = vsel %vm863_vm5, %v2657_v4, -inf }
 0x270   :  { %880 = vmax.xlane.f32.xlu1 %v879_v3 }
 0x271   :  { %v541_v42 = vpop.f32.mrb[12].mxu1  ;;  %v671_v48 = vpop.f32.mrb[22].mxu0 }
 0x272   :  { %v2662_v5 = vsel %vm829_vm6, %v541_v42, -inf  ;;  %v1863_v6 = vpop.f32.mrb[13].mxu1  ;;  %v1888_v7 = vpop.f32.mrb[23].mxu0  ;;  %v2671_v8 = vsel %vm829_vm6, %v671_v48, -inf }
 0x273   :  { %v882_v41 = vsel %vm863_vm5, %v2662_v5, -inf  ;;  %v897_v11 = vsel %vm863_vm5, %v2671_v8, -inf }
 0x274   :  { %883 = vmax.xlane.f32.xlu0 %v882_v41  ;;  %895 = vmax.xlane.f32.xlu1 %v894_v52 }
 0x275   :  { %v546_v46 = vpop.f32.mrb[14].mxu1  ;;  %v676_v51 = vpop.f32.mrb[24].mxu0 }
 0x276   :  { %v2676_v1 = vsel %vm830_vm7, %v546_v46, -inf  ;;  %v1866_v9 = vpop.f32.mrb[15].mxu1  ;;  %v1891_v10 = vpop.f32.mrb[25].mxu0  ;;  %v2685_v12 = vsel %vm830_vm7, %v676_v51, -inf }
 0x277   :  { %v885_v45 = vsel %vm863_vm5, %v2676_v1, -inf  ;;  %v900_v56 = vsel %vm863_vm5, %v2685_v12, -inf }
 0x278   :  { %886 = vmax.xlane.f32.xlu0 %v885_v45  ;;  %898 = vmax.xlane.f32.xlu1 %v897_v11 }
 0x279   :  { %v551_v13 = vpop.f32.mrb[16].mxu1  ;;  %v681_v14 = vpop.f32.mrb[26].mxu0 }
 0x27a   :  { %v2690_v15 = vsel %vm831_vm8, %v551_v13, -inf  ;;  %v1869_v54 = vpop.f32.mrb[17].mxu1  ;;  %v1894_v16 = vpop.f32.mrb[27].mxu0  ;;  %v2699_v17 = vsel %vm831_vm8, %v681_v14, -inf }
 0x27b   :  { %v888_v57 = vsel %vm863_vm5, %v2690_v15, -inf  ;;  %v903_v30 = vsel %vm863_vm5, %v2699_v17, -inf }
 0x27c   :  { %889 = vmax.xlane.f32.xlu0 %v888_v57  ;;  %901 = vmax.xlane.f32.xlu1 %v900_v56 }
 0x27d   :  { %v556_v20 = vpop.f32.mrb[18].mxu1  ;;  %v686_v22 = vpop.f32.mrb[28].mxu0 }
 0x27e   :  { %v2704_v23 = vsel %vm832_vm9, %v556_v20, -inf  ;;  %v1872_v25 = vpop.f32.mrb[19].mxu1  ;;  %v1897_v27 = vpop.f32.mrb[29].mxu0  ;;  %v2713_v33 = vsel %vm832_vm9, %v686_v22, -inf }
 0x27f   :  { %v891_v28 = vsel %vm863_vm5, %v2704_v23, -inf  ;;  %v906_v44 = vsel %vm863_vm5, %v2713_v33, -inf }
 0x280   :  { %892 = vmax.xlane.f32.xlu0 %v891_v28  ;;  %904 = vmax.xlane.f32.xlu1 %v903_v30 }
 0x281   :  { %v796_v34 = vpop.f32.mrb[20].mxu1 }
 0x282   :  { %v2718_v36 = vsel %vm828_vm4, %v796_v34, -inf  ;;  %v1910_v38 = vpop.f32.mrb[21].mxu1 }
 0x283   :  { %v909_v40 = vsel %vm863_vm5, %v2718_v36, -inf }
 0x284   :  { %910 = vmax.xlane.f32.xlu0 %v909_v40  ;;  %907 = vmax.xlane.f32.xlu1 %v906_v44 }
 0x285   :  { %v801_v50 = vpop.f32.mrb[22].mxu1 }
 0x286   :  { %v2727_v39 = vsel %vm829_vm6, %v801_v50, -inf  ;;  %v1913_v49 = vpop.f32.mrb[23].mxu1 }
 0x287   :  { %v912_v18 = vsel %vm863_vm5, %v2727_v39, -inf }
 0x288   :  { %913 = vmax.xlane.f32.xlu0 %v912_v18 }
 0x289   :  { %v806_v62 = vpop.f32.mrb[24].mxu1 }
 0x28a   :  { %v2734_v0 = vsel %vm830_vm7, %v806_v62, -inf  ;;  %v1916_v2 = vpop.f32.mrb[25].mxu1 }
 0x28b   :  { %v915_v3 = vsel %vm863_vm5, %v2734_v0, -inf }
 0x28c   :  { %916 = vmax.xlane.f32.xlu0 %v915_v3 }
 0x28d   :  { %v811_v42 = vpop.f32.mrb[26].mxu1 }
 0x28e   :  { %v2741_v60 = vsel %vm831_vm8, %v811_v42, -inf  ;;  %v1919_v48 = vpop.f32.mrb[27].mxu1 }
 0x28f   :  { %v918_v6 = vsel %vm863_vm5, %v2741_v60, -inf }
 0x290   :  { %919 = vmax.xlane.f32.xlu0 %v918_v6 }
 0x291   :  { %v816_v7 = vpop.f32.mrb[28].mxu1 }
 0x292   :  { %v2748_v24 = vsel %vm832_vm9, %v816_v7, -inf  ;;  %v1922_v41 = vpop.f32.mrb[29].mxu1 }
 0x293   :  { %v921_v52 = vsel %vm863_vm5, %v2748_v24, -inf }
 0x294   :  { %922 = vmax.xlane.f32.xlu0 %v921_v52 }
 0x295   :  { %2174 = vrot.lane.b32.xlu1 %v2421_v53, %s2294_s10 }
 0x299   :  { %2179 = vrot.lane.b32.xlu1 %v2448_v61, %s2294_s10 }
 0x2aa   :  { %2169 = vrot.lane.b32.xlu0 %v2437_v58, %s2294_s10 }
 0x2e9   :  { %v866_v29 = vpop.xlane.xlu0 %865 }
 0x2ea   :  { %v924_v46 = vsub.f32 %v2598_v21, %v866_v29 }
 0x2ec   :  { %v944_v19 = vmul.f32 1.442695, %v924_v46 }
 0x2ed   :  { %v869_v51 = vpop.xlane.xlu0 %868 }
 0x2ee   :  { %2183 = vpow2.f32 %v944_v19  ;;  %v925_v9 = vsub.f32 %v2610_v26, %v869_v51 }
 0x2f0   :  { %v946_v10 = vmul.f32 1.442695, %v925_v9 }
 0x2f1   :  { %v872_v45 = vpop.xlane.xlu1 %871 }
 0x2f2   :  { %2185 = vpow2.f32 %v946_v10  ;;  %v926_v53 = vsub.f32 %v2622_v31, %v872_v45 }
 0x2f4   :  { %v948_v11 = vmul.f32 1.442695, %v926_v53 }
 0x2f5   :  { %v875_v61 = vpop.xlane.xlu1 %874 }
 0x2f6   :  { %2187 = vpow2.f32 %v948_v11  ;;  %v927_v58 = vsub.f32 %v2634_v37, %v875_v61 }
 0x2f8   :  { %v2764_v13 = vpop.eup %2183  ;;  %v950_v21 = vmul.f32 1.442695, %v927_v58 }
 0x2f9   :  { %v878_v14 = vpop.xlane.xlu1 %877  ;;  %v984_v54 = vsel %vm863_vm5, %v2764_v13, 0.0 }
 0x2fa   :  { %2189 = vpow2.f32 %v950_v21  ;;  %v928_v26 = vsub.f32 %v2643_v47, %v878_v14  ;;  %985 = vadd.xlane.f32.xlu1 %v984_v54 }
 0x2fc   :  { %v2769_v16 = vpop.eup %2185  ;;  %v952_v57 = vmul.f32 1.442695, %v928_v26 }
 0x2fd   :  { %v881_v31 = vpop.xlane.xlu1 %880  ;;  %v987_v56 = vsel %vm863_vm5, %v2769_v16, 0.0 }
 0x2fe   :  { %2191 = vpow2.f32 %v952_v57  ;;  %v929_v37 = vsub.f32 %v2650_v63, %v881_v31  ;;  %988 = vadd.xlane.f32.xlu1 %v987_v56 }
 0x300   :  { %v2774_v20 = vpop.eup %2187  ;;  %v954_v22 = vmul.f32 1.442695, %v929_v37 }
 0x301   :  { %v884_v25 = vpop.xlane.xlu0 %883  ;;  %v896_v27 = vpop.xlane.xlu1 %895  ;;  %v990_v47 = vsel %vm863_vm5, %v2774_v20, 0.0 }
 0x302   :  { %2193 = vpow2.f32 %v954_v22  ;;  %v930_v28 = vsub.f32 %v2662_v5, %v884_v25  ;;  %v934_v30 = vsub.f32 %v2657_v4, %v896_v27  ;;  %991 = vadd.xlane.f32.xlu1 %v990_v47 }
 0x304   :  { %v2780_v34 = vpop.eup %2189  ;;  %v956_v38 = vmul.f32 1.442695, %v930_v28  ;;  %v964_v40 = vmul.f32 1.442695, %v934_v30 }
 0x305   :  { %v887_v63 = vpop.xlane.xlu0 %886  ;;  %v899_v44 = vpop.xlane.xlu1 %898  ;;  %v993_v50 = vsel %vm863_vm5, %v2780_v34, 0.0 }
 0x306   :  { %2195 = vpow2.f32 %v956_v38  ;;  %v931_v49 = vsub.f32 %v2676_v1, %v887_v63  ;;  %v935_v18 = vsub.f32 %v2671_v8, %v899_v44  ;;  %994 = vadd.xlane.f32.xlu1 %v993_v50 }
 0x307   :  { %2197 = vpow2.f32 %v964_v40 }
 0x308   :  { %v2786_v5 = vpop.eup %2191  ;;  %v958_v4 = vmul.f32 1.442695, %v931_v49  ;;  %v966_v62 = vmul.f32 1.442695, %v935_v18 }
 0x309   :  { %v890_v2 = vpop.xlane.xlu0 %889  ;;  %v902_v3 = vpop.xlane.xlu1 %901  ;;  %v996_v42 = vsel %vm863_vm5, %v2786_v5, 0.0 }
 0x30a   :  { %2199 = vpow2.f32 %v958_v4  ;;  %v932_v48 = vsub.f32 %v2690_v15, %v890_v2  ;;  %v936_v6 = vsub.f32 %v2685_v12, %v902_v3  ;;  %997 = vadd.xlane.f32.xlu1 %v996_v42 }
 0x30b   :  { %2201 = vpow2.f32 %v966_v62 }
 0x30c   :  { %v2792_v1 = vpop.eup %2193  ;;  %v960_v8 = vmul.f32 1.442695, %v932_v48  ;;  %v968_v7 = vmul.f32 1.442695, %v936_v6 }
 0x30d   :  { %v893_v41 = vpop.xlane.xlu0 %892  ;;  %v905_v52 = vpop.xlane.xlu1 %904  ;;  %v999_v29 = vsel %vm863_vm5, %v2792_v1, 0.0 }
 0x30e   :  { %2203 = vpow2.f32 %v960_v8  ;;  %v933_v46 = vsub.f32 %v2704_v23, %v893_v41  ;;  %v937_v19 = vsub.f32 %v2699_v17, %v905_v52  ;;  %1000 = vadd.xlane.f32.xlu0 %v999_v29 }
 0x30f   :  { %2205 = vpow2.f32 %v968_v7 }
 0x310   :  { %v2798_v15 = vpop.eup %2195  ;;  %v962_v12 = vmul.f32 1.442695, %v933_v46  ;;  %v970_v51 = vmul.f32 1.442695, %v937_v19 }
 0x311   :  { %v2800_v9 = vpop.eup %2197  ;;  %v911_v10 = vpop.xlane.xlu0 %910  ;;  %v1002_v53 = vsel %vm863_vm5, %v2798_v15, 0.0 }
 0x312   :  { %v908_v45 = vpop.xlane.xlu1 %907  ;;  %2207 = vpow2.f32 %v962_v12  ;;  %v939_v11 = vsub.f32 %v2718_v36, %v911_v10  ;;  %v1014_v17 = vsel %vm863_vm5, %v2800_v9, 0.0  ;;  %1003 = vadd.xlane.f32.xlu0 %v1002_v53  ;;  %v2167_v12 = vunpack.i.h.bf16 %v2759_v35 }
 0x313   :  { %v938_v23 = vsub.f32 %v2713_v33, %v908_v45  ;;  %2209 = vpow2.f32 %v970_v51  ;;  %1015 = vadd.xlane.f32.xlu1 %v1014_v17  ;;  %v2166_v51 = vunpack.i.l.bf16 %v2759_v35 }
 0x314   :  { %v2808_v61 = vpop.eup %2199  ;;  %v974_v58 = vmul.f32 1.442695, %v939_v11 }
 0x315   :  { %v972_v21 = vmul.f32 1.442695, %v938_v23  ;;  %v2810_v14 = vpop.eup %2201  ;;  %v914_v54 = vpop.xlane.xlu0 %913  ;;  %v1005_v26 = vsel %vm863_vm5, %v2808_v61, 0.0  ;;  %v2084_v53 = vpack.c.bf16 %v2167_v12, %v2166_v51 }
 0x316   :  { %2211 = vpow2.f32 %v974_v58  ;;  %v940_v36 = vsub.f32 %v2727_v39, %v914_v54  ;;  %1006 = vadd.xlane.f32.xlu0 %v1005_v26  ;;  %v1017_v33 = vsel %vm863_vm5, %v2810_v14, 0.0  ;;  %v2175_v41 = vpop.permute.xlu1 %2174 }
 0x317   :  { %2213 = vpow2.f32 %v972_v21  ;;  %1018 = vadd.xlane.f32.xlu1 %v1017_v33  ;;  %v2177_v11 = vunpack.i.h.bf16 %v2175_v41 }
 0x318   :  { %v2817_v57 = vpop.eup %2203  ;;  %v976_v31 = vmul.f32 1.442695, %v940_v36 }
 0x319   :  { %v2819_v56 = vpop.eup %2205  ;;  %v917_v37 = vpop.xlane.xlu0 %916  ;;  %v1008_v22 = vsel %vm863_vm5, %v2817_v57, 0.0 }
 0x31a   :  { %2215 = vpow2.f32 %v976_v31  ;;  %v941_v25 = vsub.f32 %v2734_v0, %v917_v37  ;;  %1009 = vadd.xlane.f32.xlu0 %v1008_v22  ;;  %v1020_v39 = vsel %vm863_vm5, %v2819_v56, 0.0  ;;  %v2864_v52 = vpop.permute.xlu1 %2179 }
 0x31b   :  { %1021 = vadd.xlane.f32.xlu1 %v1020_v39 }
 0x31c   :  { %v2826_v27 = vpop.eup %2207  ;;  %v978_v47 = vmul.f32 1.442695, %v941_v25 }
 0x31d   :  { %v2828_v28 = vpop.eup %2209  ;;  %v920_v30 = vpop.xlane.xlu0 %919  ;;  %v1011_v38 = vsel %vm863_vm5, %v2826_v27, 0.0 }
 0x31e   :  { %2217 = vpow2.f32 %v978_v47  ;;  %v942_v40 = vsub.f32 %v2741_v60, %v920_v30  ;;  %v1023_v0 = vsel %vm863_vm5, %v2828_v28, 0.0  ;;  %1012 = vadd.xlane.f32.xlu0 %v1011_v38 }
 0x31f   :  { %1024 = vadd.xlane.f32.xlu1 %v1023_v0  ;;  %v2181_v0 = vunpack.i.l.bf16 %v2864_v52 }
 0x320   :  { %v2835_v63 = vpop.eup %2211  ;;  %v980_v44 = vmul.f32 1.442695, %v942_v40  ;;  %v2182_v40 = vunpack.i.h.bf16 %v2864_v52 }
 0x321   :  { %v2837_v50 = vpop.eup %2213  ;;  %v923_v49 = vpop.xlane.xlu0 %922  ;;  %v1029_v18 = vsel %vm863_vm5, %v2835_v63, 0.0 }
 0x322   :  { %2219 = vpow2.f32 %v980_v44  ;;  %v943_v4 = vsub.f32 %v2748_v24, %v923_v49  ;;  %v1026_v60 = vsel %vm863_vm5, %v2837_v50, 0.0  ;;  %1030 = vadd.xlane.f32.xlu0 %v1029_v18 }
 0x323   :  { %1027 = vadd.xlane.f32.xlu1 %v1026_v60 }
 0x324   :  { %v2844_v62 = vpop.eup %2215  ;;  %v982_v2 = vmul.f32 1.442695, %v943_v4  ;;  %v2093_v4 = vpack.c.bf16 %v2182_v40, %v2181_v0 }
 0x325   :  { %v1032_v3 = vsel %vm863_vm5, %v2844_v62, 0.0  ;;  %v2170_v17 = vpop.permute.xlu0 %2169 }
 0x326   :  { %2221 = vpow2.f32 %v982_v2  ;;  %1033 = vadd.xlane.f32.xlu0 %v1032_v3  ;;  %v2172_v25 = vunpack.i.h.bf16 %v2170_v17  ;;  %v2171_v39 = vunpack.i.l.bf16 %v2170_v17 }
 0x328   :  { %v2848_v42 = vpop.eup %2217  ;;  %v2090_v44 = vpack.c.bf16 %v2172_v25, %v2171_v39 }
 0x329   :  { %v1035_v48 = vsel %vm863_vm5, %v2848_v42, 0.0 }
 0x32a   :  { %1036 = vadd.xlane.f32.xlu0 %v1035_v48 }
 0x32c   :  { %v2852_v24 = vpop.eup %2219 }
 0x32d   :  { %v1038_v6 = vsel %vm863_vm5, %v2852_v24, 0.0 }
 0x32e   :  { %1039 = vadd.xlane.f32.xlu0 %v1038_v6 }
 0x330   :  { %v2856_v8 = vpop.eup %2221 }
 0x331   :  { %v1041_v7 = vsel %vm863_vm5, %v2856_v8, 0.0 }
 0x332   :  { %1042 = vadd.xlane.f32.xlu0 %v1041_v7 }
 0x334   :  { %1452 = vrot.lane.b32.xlu1 %v2442_v59, %s2294_s10 }
 0x348   :  { %1332 = vrot.lane.b32.xlu0 %v2427_v55, %s2294_s10  ;;  %v2176_v55 = vunpack.i.l.bf16 %v2175_v41 }
 0x34a   :  { %v2087_v21 = vpack.c.bf16 %v2177_v11, %v2176_v55 }
 0x387   :  { %v986_v29 = vpop.xlane.xlu1 %985 }
 0x388   :  { %2223 = vrcp.f32 %v986_v29 }
 0x38b   :  { %v989_v46 = vpop.xlane.xlu1 %988 }
 0x38c   :  { %2225 = vrcp.f32 %v989_v46 }
 0x38f   :  { %v992_v19 = vpop.xlane.xlu1 %991 }
 0x390   :  { %2227 = vrcp.f32 %v992_v19 }
 0x392   :  { %v2224_v10 = vpop.eup %2223 }
 0x393   :  { %v1045_v45 = vmul.f32 %v2224_v10, %v2764_v13  ;;  %v995_v59 = vpop.xlane.xlu1 %994 }
 0x394   :  { %2229 = vrcp.f32 %v995_v59 }
 0x395   :  { %1934 = vmatmul.mubr.msk.f32.vlgmr.msra.gmra.mrb[30].mxu0 %vm863_vm5, %v1045_v45 }
 0x396   :  { %v2226_v23 = vpop.eup %2225  ;;  %2085 = vmatpush3.bf16.msra.mxu0 %v2084_v53  ;;  %1936 = vmatprep.mubr.msk.f32.mxu0 %vm2292_vm1, %v2293_v43 }
 0x397   :  { %v998_v58 = vpop.xlane.xlu1 %997  ;;  %2086 = vmatprep.subr.bf16.mxu0 %v2290_v32  ;;  %v1047_v35 = vmul.f32 %v2226_v23, %v2769_v16 }
 0x398   :  { %2231 = vrcp.f32 %v998_v58 }
 0x399   :  { %1937 = vmatmul.mubr.msk.f32.gmra.mrb[32].mxu0 %vm863_vm5, %v1047_v35 }
 0x39a   :  { %v2228_v13 = vpop.eup %2227  ;;  %2088 = vmatpush3.bf16.msra.mxu0 %v2087_v21  ;;  %1939 = vmatprep.mubr.msk.f32.mxu0 %vm2292_vm1, %v2293_v43 }
 0x39b   :  { %v1001_v54 = vpop.xlane.xlu0 %1000  ;;  %v1049_v26 = vmul.f32 %v2228_v13, %v2774_v20  ;;  %1981 = vmatprep.subr.mxu0 %v2293_v43 }
 0x39c   :  { %2233 = vrcp.f32 %v1001_v54 }
 0x39d   :  { %1940 = vmatmul.mubr.msk.f32.gmra.mrb[34].mxu0 %vm863_vm5, %v1049_v26 }
 0x39e   :  { %v2230_v36 = vpop.eup %2229  ;;  %1942 = vmatprep.mubr.msk.f32.mxu0 %vm2292_vm1, %v2293_v43 }
 0x39f   :  { %v1004_v16 = vpop.xlane.xlu0 %1003  ;;  %v1051_v33 = vmul.f32 %v2230_v36, %v2780_v34 }
 0x3a0   :  { %v1016_v31 = vpop.xlane.xlu1 %1015  ;;  %2235 = vrcp.f32 %v1004_v16 }
 0x3a1   :  { %1943 = vmatmul.mubr.msk.f32.gmra.mrb[36].mxu0 %vm863_vm5, %v1051_v33 }
 0x3a2   :  { %v2232_v37 = vpop.eup %2231  ;;  %1945 = vmatprep.mubr.msk.f32.mxu0 %vm2292_vm1, %v2293_v43 }
 0x3a3   :  { %v1007_v20 = vpop.xlane.xlu0 %1006  ;;  %v1053_v22 = vmul.f32 %v2232_v37, %v2786_v5 }
 0x3a4   :  { %2237 = vrcp.f32 %v1007_v20  ;;  %v1019_v47 = vpop.xlane.xlu1 %1018 }
 0x3a5   :  { %1946 = vmatmul.mubr.msk.f32.gmra.mrb[38].mxu0 %vm863_vm5, %v1053_v22 }
 0x3a6   :  { %v2234_v30 = vpop.eup %2233  ;;  %1983 = vmatprep.mubr.msk.f32.mxu0 %vm2292_vm1, %v2293_v43 }
 0x3a7   :  { %v1055_v34 = vmul.f32 %v2234_v30, %v2792_v1  ;;  %v1010_v38 = vpop.xlane.xlu0 %1009 }
 0x3a8   :  { %2239 = vrcp.f32 %v1010_v38  ;;  %v1022_v5 = vpop.xlane.xlu1 %1021 }
 0x3a9   :  { %1959 = vmatmul.mubr.msk.f32.vlgmr.msra.gmra.mrb[30].mxu1 %vm863_vm5, %v1055_v34 }
 0x3aa   :  { %v2236_v49 = vpop.eup %2235  ;;  %2091 = vmatpush3.bf16.msra.mxu1 %v2090_v44  ;;  %1961 = vmatprep.mubr.msk.f32.mxu1 %vm2292_vm1, %v2293_v43 }
 0x3ab   :  { %v1013_v18 = vpop.xlane.xlu0 %1012  ;;  %2092 = vmatprep.subr.bf16.mxu1 %v2290_v32  ;;  %v1057_v1 = vmul.f32 %v2236_v49, %v2798_v15 }
 0x3ac   :  { %2241 = vrcp.f32 %v1013_v18  ;;  %v1025_v60 = vpop.xlane.xlu1 %1024 }
 0x3ad   :  { %1962 = vmatmul.mubr.msk.f32.gmra.mrb[32].mxu1 %vm863_vm5, %v1057_v1 }
 0x3ae   :  { %v2238_v2 = vpop.eup %2237  ;;  %2094 = vmatpush3.bf16.msra.mxu1 %v2093_v4  ;;  %1964 = vmatprep.mubr.msk.f32.mxu1 %vm2292_vm1, %v2293_v43 }
 0x3af   :  { %v1031_v3 = vpop.xlane.xlu0 %1030  ;;  %v1059_v48 = vmul.f32 %v2238_v2, %v2808_v61  ;;  %2006 = vmatprep.subr.mxu1 %v2293_v43 }
 0x3b0   :  { %2243 = vrcp.f32 %v1031_v3  ;;  %v1028_v6 = vpop.xlane.xlu1 %1027 }
 0x3b1   :  { %1965 = vmatmul.mubr.msk.f32.gmra.mrb[34].mxu1 %vm863_vm5, %v1059_v48 }
 0x3b2   :  { %v2240_v32 = vpop.eup %2239  ;;  %1967 = vmatprep.mubr.msk.f32.mxu1 %vm2292_vm1, %v2293_v43 }
 0x3b3   :  { %v1034_v15 = vpop.xlane.xlu0 %1033  ;;  %v1061_v7 = vmul.f32 %v2240_v32, %v2817_v57 }
 0x3b4   :  { %2245 = vrcp.f32 %v1034_v15  ;;  %v1453_v41 = vpop.permute.xlu1 %1452 }
 0x3b5   :  { %1968 = vmatmul.mubr.msk.f32.gmra.mrb[36].mxu1 %vm863_vm5, %v1061_v7  ;;  %2247 = vrcp.f32 %v1016_v31 }
 0x3b6   :  { %v2242_v52 = vpop.eup %2241  ;;  %2007 = vmatpush3.msra.mxu1 %v1453_v41  ;;  %1970 = vmatprep.mubr.msk.f32.mxu1 %vm2292_vm1, %v2293_v43 }
 0x3b7   :  { %v1037_v61 = vpop.xlane.xlu0 %1036  ;;  %v1063_v29 = vmul.f32 %v2242_v52, %v2826_v27 }
 0x3b8   :  { %2249 = vrcp.f32 %v1037_v61 }
 0x3b9   :  { %1971 = vmatmul.mubr.msk.f32.gmra.mrb[38].mxu1 %vm863_vm5, %v1063_v29  ;;  %2251 = vrcp.f32 %v1019_v47 }
 0x3ba   :  { %v2244_v46 = vpop.eup %2243  ;;  %2008 = vmatprep.mubr.msk.f32.mxu1 %vm2292_vm1, %v2293_v43 }
 0x3bb   :  { %v1075_v57 = vmul.f32 %v2244_v46, %v2835_v63  ;;  %v1040_v19 = vpop.xlane.xlu0 %1039 }
 0x3bc   :  { %2253 = vrcp.f32 %v1040_v19 }
 0x3bd   :  { %2009 = vmatmul.mubr.msk.f32.vlgmr.msra.gmra.mrb[40].mxu1 %vm863_vm5, %v1075_v57  ;;  %2255 = vrcp.f32 %v1022_v5 }
 0x3be   :  { %v2246_v12 = vpop.eup %2245  ;;  %2011 = vmatprep.mubr.msk.f32.mxu1 %vm2292_vm1, %v2293_v43 }
 0x3bf   :  { %v1043_v27 = vpop.xlane.xlu0 %1042  ;;  %v1077_v51 = vmul.f32 %v2246_v12, %v2844_v62  ;;  %v2248_v10 = vpop.eup %2247 }
 0x3c0   :  { %2257 = vrcp.f32 %v1043_v27  ;;  %v1065_v63 = vmul.f32 %v2248_v10, %v2800_v9 }
 0x3c1   :  { %2012 = vmatmul.mubr.msk.f32.gmra.mrb[42].mxu1 %vm863_vm5, %v1077_v51  ;;  %2259 = vrcp.f32 %v1025_v60 }
 0x3c2   :  { %v2250_v45 = vpop.eup %2249  ;;  %2014 = vmatprep.mubr.msk.f32.mxu1 %vm2292_vm1, %v2293_v43  ;;  %2261 = vrcp.f32 %v1028_v6 }
 0x3c3   :  { %v1333_v59 = vpop.permute.xlu0 %1332  ;;  %v1079_v53 = vmul.f32 %v2250_v45, %v2848_v42  ;;  %v2252_v11 = vpop.eup %2251 }
 0x3c4   :  { %1982 = vmatpush3.msra.mxu0 %v1333_v59  ;;  %v1067_v55 = vmul.f32 %v2252_v11, %v2810_v14 }
 0x3c5   :  { %1984 = vmatmul.mubr.msk.f32.vlgmr.msra.gmra.mrb[40].mxu0 %vm863_vm5, %v1065_v63  ;;  %2015 = vmatmul.mubr.msk.f32.gmra.mrb[44].mxu1 %vm863_vm5, %v1079_v53 }
 0x3c6   :  { %v2254_v62 = vpop.eup %2253  ;;  %1986 = vmatprep.mubr.msk.f32.mxu0 %vm2292_vm1, %v2293_v43  ;;  %2017 = vmatprep.mubr.msk.f32.mxu1 %vm2292_vm1, %v2293_v43 }
 0x3c7   :  { %v1081_v9 = vmul.f32 %v2254_v62, %v2852_v24  ;;  %v2256_v23 = vpop.eup %2255 }
 0x3c8   :  { %v1069_v17 = vmul.f32 %v2256_v23, %v2819_v56 }
 0x3c9   :  { %1987 = vmatmul.mubr.msk.f32.gmra.mrb[42].mxu0 %vm863_vm5, %v1067_v55  ;;  %2018 = vmatmul.mubr.msk.f32.gmra.mrb[46].mxu1 %vm863_vm5, %v1081_v9 }
 0x3ca   :  { %v2258_v42 = vpop.eup %2257  ;;  %1989 = vmatprep.mubr.msk.f32.mxu0 %vm2292_vm1, %v2293_v43  ;;  %2020 = vmatprep.mubr.msk.f32.mxu1 %vm2292_vm1, %v2293_v43 }
 0x3cb   :  { %v1083_v58 = vmul.f32 %v2258_v42, %v2856_v8  ;;  %v2260_v35 = vpop.eup %2259 }
 0x3cc   :  { %v1071_v14 = vmul.f32 %v2260_v35, %v2828_v28  ;;  %v2262_v24 = vpop.eup %2261 }
 0x3cd   :  { %1990 = vmatmul.mubr.msk.f32.gmra.mrb[44].mxu0 %vm863_vm5, %v1069_v17  ;;  %2021 = vmatmul.mubr.msk.f32.gmra.mrb[48].mxu1 %vm863_vm5, %v1083_v58  ;;  %v1073_v56 = vmul.f32 %v2262_v24, %v2837_v50 }
 0x3ce   :  { %1992 = vmatprep.mubr.msk.f32.mxu0 %vm2292_vm1, %v2293_v43 }
 0x3d1   :  { %1993 = vmatmul.mubr.msk.f32.gmra.mrb[46].mxu0 %vm863_vm5, %v1071_v14 }
 0x3d2   :  { %1995 = vmatprep.mubr.msk.f32.mxu0 %vm2292_vm1, %v2293_v43 }
 0x3d5   :  { %1996 = vmatmul.mubr.msk.f32.gmra.mrb[48].mxu0 %vm863_vm5, %v1073_v56 }
 0x468   :  { %v1180_v8 = vpop.f32.mrb[30].mxu0 }
 0x469   :  { %1564 = vst.msk [vmem:[%s3032_s2] sm:$0xff] %vm314_vm2, %v1180_v8  ;;  %v1935_v21 = vpop.f32.mrb[31].mxu0 }
 0x46c   :  { %v1185_v13 = vpop.f32.mrb[32].mxu0 }
 0x46d   :  { %1565 = vst.msk [vmem:[%s3032_s2 + $0x8] sm:$0xff] %vm314_vm2, %v1185_v13  ;;  %v1938_v28 = vpop.f32.mrb[33].mxu0 }
 0x470   :  { %v1190_v54 = vpop.f32.mrb[34].mxu0 }
 0x471   :  { %1566 = vst.msk [vmem:[%s3032_s2 + $0x10] sm:$0xff] %vm314_vm2, %v1190_v54  ;;  %v1941_v43 = vpop.f32.mrb[35].mxu0 }
 0x474   :  { %v1195_v50 = vpop.f32.mrb[36].mxu0 }
 0x475   :  { %1567 = vst.msk [vmem:[%s3032_s2 + $0x18] sm:$0xff] %vm314_vm2, %v1195_v50  ;;  %v1944_v26 = vpop.f32.mrb[37].mxu0 }
 0x478   :  { %v1200_v36 = vpop.f32.mrb[38].mxu0 }
 0x479   :  { %1568 = vst.msk [vmem:[%s3032_s2 + $0x20] sm:$0xff] %vm314_vm2, %v1200_v36  ;;  %v1947_v16 = vpop.f32.mrb[39].mxu0 }
 0x47c   :  { %v1300_v33 = vpop.f32.mrb[30].mxu1 }
 0x47d   :  { %1569 = vst.msk [vmem:[%s3032_s2 + $0x28] sm:$0xff] %vm314_vm2, %v1300_v33  ;;  %v1960_v31 = vpop.f32.mrb[31].mxu1 }
 0x480   :  { %v1305_v37 = vpop.f32.mrb[32].mxu1 }
 0x481   :  { %1570 = vst.msk [vmem:[%s3032_s2 + $0x30] sm:$0xff] %vm314_vm2, %v1305_v37  ;;  %v1963_v20 = vpop.f32.mrb[33].mxu1 }
 0x484   :  { %v1310_v22 = vpop.f32.mrb[34].mxu1 }
 0x485   :  { %1571 = vst.msk [vmem:[%s3032_s2 + $0x38] sm:$0xff] %vm314_vm2, %v1310_v22  ;;  %v1966_v25 = vpop.f32.mrb[35].mxu1 }
 0x488   :  { %v1315_v39 = vpop.f32.mrb[36].mxu1 }
 0x489   :  { %1572 = vst.msk [vmem:[%s3032_s2 + $0x40] sm:$0xff] %vm314_vm2, %v1315_v39  ;;  %v1969_v47 = vpop.f32.mrb[37].mxu1 }
 0x48c   :  { %v1320_v30 = vpop.f32.mrb[38].mxu1 }
 0x48d   :  { %1573 = vst.msk [vmem:[%s3032_s2 + $0x48] sm:$0xff] %vm314_vm2, %v1320_v30  ;;  %v1972_v34 = vpop.f32.mrb[39].mxu1 }
 0x490   :  { %v1540_v38 = vpop.f32.mrb[40].mxu1 }
 0x491   :  { %1579 = vst.msk [vmem:[%s3032_s2 + $0x78] sm:$0xff] %vm314_vm2, %v1540_v38  ;;  %v2010_v40 = vpop.f32.mrb[41].mxu1 }
 0x494   :  { %v1545_v0 = vpop.f32.mrb[42].mxu1 }
 0x495   :  { %1580 = vst.msk [vmem:[%s3032_s2 + $0x80] sm:$0xff] %vm314_vm2, %v1545_v0  ;;  %v2013_v44 = vpop.f32.mrb[43].mxu1 }
 0x498   :  { %v1420_v5 = vpop.f32.mrb[40].mxu0  ;;  %v1550_v49 = vpop.f32.mrb[44].mxu1 }
 0x499   :  { %1574 = vst.msk [vmem:[%s3032_s2 + $0x50] sm:$0xff] %vm314_vm2, %v1420_v5  ;;  %1581 = vst.msk [vmem:[%s3032_s2 + $0x88] sm:$0xff] %vm314_vm2, %v1550_v49  ;;  %v1985_v18 = vpop.f32.mrb[41].mxu0  ;;  %v2016_v1 = vpop.f32.mrb[45].mxu1 }
 0x49c   :  { %v1425_v4 = vpop.f32.mrb[42].mxu0  ;;  %v1555_v60 = vpop.f32.mrb[46].mxu1 }
 0x49d   :  { %1575 = vst.msk [vmem:[%s3032_s2 + $0x58] sm:$0xff] %vm314_vm2, %v1425_v4  ;;  %1582 = vst.msk [vmem:[%s3032_s2 + $0x90] sm:$0xff] %vm314_vm2, %v1555_v60  ;;  %v1988_v2 = vpop.f32.mrb[43].mxu0  ;;  %v2019_v3 = vpop.f32.mrb[47].mxu1 }
 0x4a0   :  { %v1430_v48 = vpop.f32.mrb[44].mxu0  ;;  %v1560_v6 = vpop.f32.mrb[48].mxu1 }
 0x4a1   :  { %1576 = vst.msk [vmem:[%s3032_s2 + $0x60] sm:$0xff] %vm314_vm2, %v1430_v48  ;;  %1583 = vst.msk [vmem:[%s3032_s2 + $0x98] sm:$0xff] %vm314_vm2, %v1560_v6  ;;  %v1991_v32 = vpop.f32.mrb[45].mxu0  ;;  %v2022_v15 = vpop.f32.mrb[49].mxu1 }
 0x4a4   :  { %v1435_v7 = vpop.f32.mrb[46].mxu0 }
 0x4a5   :  { %1577 = vst.msk [vmem:[%s3032_s2 + $0x68] sm:$0xff] %vm314_vm2, %v1435_v7  ;;  %v1994_v41 = vpop.f32.mrb[47].mxu0 }
 0x4a8   :  { %v1440_v52 = vpop.f32.mrb[48].mxu0 }
 0x4a9   :  { %1578 = vst.msk [vmem:[%s3032_s2 + $0x70] sm:$0xff] %vm314_vm2, %v1440_v52  ;;  %v1997_v61 = vpop.f32.mrb[49].mxu0 }
 0x4aa   :  { %1588 = vsyncpa [#allocation3], 1 }

</bundles_post_ra>
